<compile_context>
chip_gen: v6e
topology: v6e:2x2x1
jax: 0.10.0
libtpu: 0.0.40
codegen_flags: <defaults>
</compile_context>

<pallas_src>
import math

import jax
import jax.numpy as jnp
from jax.experimental import pallas as pl
from jax.experimental.pallas import tpu as pltpu

_GELU_C = math.sqrt(2.0 / math.pi)
_GELU_C3 = _GELU_C * 0.044715


def _round_up(n, m):
    return ((n + m - 1) // m) * m


def _pad2d(a, rows, cols):
    r, c = a.shape
    if r == rows and c == cols:
        return a
    return jnp.pad(a, ((0, rows - r), (0, cols - c)))


def _choose_tile_m(M, block_m):
    """Row tile: small M -> one tile (sublane multiple); large M -> 128/256
    multiples and at least 2 tiles so v7x's two TensorCores both get work."""
    if M <= 128:
        return _round_up(M, 16)
    n_tiles = max(pl.cdiv(M, block_m), 2)
    return _round_up(pl.cdiv(M, n_tiles), 128)


def _choose_tile_i(Ip, block_i):
    """Largest multiple of 128 that divides Ip and is <= block_i, so every
    W1/W2 block is a full (unmasked, lane-dense) tile."""
    block_i = max(128, (block_i // 128) * 128)
    if Ip <= block_i:
        return Ip
    best = 128
    for d in range(128, block_i + 1, 128):
        if Ip % d == 0:
            best = d
    return best


def _vmem_limit_bytes(frac=0.85):
    """Raise the scoped-VMEM limit with headroom under physical VMEM
    (v7x: 64 MiB/TC, v5e/v6e: 128 MiB).  Conservative fallback = 64 MiB."""
    try:
        cap = int(pltpu.get_tpu_info().vmem_capacity_bytes)
    except Exception:
        cap = 64 * 1024 * 1024
    return min(int(cap * frac), 112 * 1024 * 1024)


def _mlp_kernel(x_ref, w1_ref, b1_ref, w2_ref, b2_ref, o_ref, acc_ref):
    k = pl.program_id(1)

    @pl.when(k == 0)
    def _init():
        acc_ref[...] = jnp.zeros_like(acc_ref)

    # dense_1 partial: (tm, Hp) @ (Hp, tI) -> f32 accumulation, + b1 I-slab.
    h = jnp.dot(x_ref[...], w1_ref[...], preferred_element_type=jnp.float32)
    h = h + b1_ref[...].astype(jnp.float32)

    # tanh-GELU in f32 — exact PyTorch formula with the constant folded:
    #   C*(h + 0.044715*h^3) == h*(C + (C*0.044715)*h*h).
    # TODO(synk): on v6e/v7x (bf16 VPU/EUP) the GELU tail could run in bf16 to
    # halve vld/vst traffic of the (tm, tI) intermediate; v5e needs f32.
    g = 0.5 * h * (1.0 + jnp.tanh(h * (_GELU_C + _GELU_C3 * (h * h))))

    # dense_2 partial: accumulate into the resident f32 scratch.
    acc_ref[...] += jnp.dot(g.astype(w2_ref.dtype), w2_ref[...],
                            preferred_element_type=jnp.float32)

    # Finalize exactly once: add b2, cast, lane-dense (full-Hp) store.
    @pl.when(k == pl.num_programs(1) - 1)
    def _finalize():
        o_ref[...] = (acc_ref[...] + b2_ref[...].astype(jnp.float32)
                      ).astype(o_ref.dtype)


def prepare_mlp_params(w1, b1, w2, b2, *, compute_dtype=jnp.bfloat16):
    """Pad H/I to lane multiples (128) and cast to the MXU operand dtype ONCE,
    hoisted out of the forward pass (no per-call weight pad/cast HBM traffic).

    Zero padding is mathematically inert: padded K columns are 0, GELU(0)=0,
    padded output columns are 0 and sliced off in the wrapper.
    Weights stored as (in, out); biases as (1, out) — same math as nn.Linear.
    """
    H, I = w1.shape
    Hp = _round_up(H, 128)
    Ip = _round_up(I, 128)
    return {
        "w1": _pad2d(w1, Hp, Ip).astype(compute_dtype),
        "b1": _pad2d(b1.reshape(1, -1), 1, Ip).astype(jnp.float32),
        "w2": _pad2d(w2, Ip, Hp).astype(compute_dtype),
        "b2": _pad2d(b2.reshape(1, -1), 1, Hp).astype(jnp.float32),
        "H": H,
        "I": I,
        "compute_dtype": compute_dtype,
    }


def mlp_forward(x, params, *, block_m=256, block_i=1024):
    """x: (B, S, H) -> (B, S, H).

    block_i sizes the I (reduction) tile: 1024 fits v7x's 64 MiB VMEM at
    Hp=4096 / tm=256; pass 2048 on v5e/v6e (128 MiB VMEM).
    """
    B, S, H = x.shape
    assert H == params["H"], "hidden size mismatch with prepared params"
    I = params["I"]
    compute_dtype = params["compute_dtype"]
    w1_p, b1_p = params["w1"], params["b1"]
    w2_p, b2_p = params["w2"], params["b2"]
    Hp, Ip = w1_p.shape
    out_dtype = x.dtype

    M = B * S
    tm = _choose_tile_m(M, block_m)
    Mp = _round_up(M, tm)
    tI = _choose_tile_i(Ip, block_i)

    # Fast path: skip the extra pad/slice HBM pass when shapes already align
    # (H % 128 == 0 holds for all production models).
    # TODO(synk): handle the M remainder with a masked final tile instead of
    # row padding to avoid wasted MXU work when M is far from a tile multiple.
    x2 = x.reshape(M, H)
    padded = (Mp != M) or (Hp != H)
    if padded:
        x2 = jnp.pad(x2, ((0, Mp - M), (0, Hp - H)))
    x_p = x2.astype(compute_dtype)

    grid = (Mp // tm, Ip // tI)

    def _nbytes(a):
        return a.size * a.dtype.itemsize

    cost = pl.CostEstimate(
        flops=4 * M * H * I,                              # two matmuls, true dims
        transcendentals=M * I,                            # one tanh per GELU elem
        bytes_accessed=(M * H * x.dtype.itemsize
                        + _nbytes(w1_p) + _nbytes(w2_p)
                        + _nbytes(b1_p) + _nbytes(b2_p)
                        + M * H * jnp.dtype(out_dtype).itemsize),
    )

    out = pl.pallas_call(
        _mlp_kernel,
        out_shape=jax.ShapeDtypeStruct((Mp, Hp), out_dtype),
        grid=grid,
        in_specs=[
            pl.BlockSpec((tm, Hp), lambda i, k: (i, 0)),   # x row tile (held over k)
            pl.BlockSpec((Hp, tI), lambda i, k: (0, k)),   # W1 I-slab (streamed)
            pl.BlockSpec((1, tI), lambda i, k: (0, k)),    # b1 I-slab
            pl.BlockSpec((tI, Hp), lambda i, k: (k, 0)),   # W2 I-slab (streamed)
            pl.BlockSpec((1, Hp), lambda i, k: (0, 0)),    # b2 (tiny, resident)
        ],
        out_specs=pl.BlockSpec((tm, Hp), lambda i, k: (i, 0)),
        scratch_shapes=[pltpu.VMEM((tm, Hp), jnp.float32)],   # f32 accumulator
        compiler_params=pltpu.CompilerParams(
            dimension_semantics=("parallel", "arbitrary"),
            vmem_limit_bytes=_vmem_limit_bytes(),
        ),
        cost_estimate=cost,
    )(x_p, w1_p, b1_p, w2_p, b2_p)

    if padded:
        out = out[:M, :H]
    return out.reshape(B, S, H)


def init_mlp_params(key, hidden_size, intermediate_size, dtype=jnp.float32):
    """Deterministic init mimicking torch.nn.Linear's default uniform init.
    PyTorch stores weight as (out, in); we store the transpose (in, out) so
    the kernel computes x @ W directly — identical math."""
    k1, k2, k3, k4 = jax.random.split(key, 4)
    bound1 = 1.0 / math.sqrt(hidden_size)
    bound2 = 1.0 / math.sqrt(intermediate_size)
    w1 = jax.random.uniform(k1, (hidden_size, intermediate_size),
                            dtype, -bound1, bound1)
    b1 = jax.random.uniform(k2, (1, intermediate_size), dtype, -bound1, bound1)
    w2 = jax.random.uniform(k3, (intermediate_size, hidden_size),
                            dtype, -bound2, bound2)
    b2 = jax.random.uniform(k4, (1, hidden_size), dtype, -bound2, bound2)
    return w1, b1, w2, b2


def mlp_reference(x, w1, b1, w2, b2):
    """Pure-JAX reference with the exact tanh-GELU of the PyTorch module."""
    B, S, H = x.shape
    hi = jax.lax.Precision.HIGHEST
    h = jnp.dot(x.reshape(-1, H), w1, precision=hi) + b1
    g = 0.5 * h * (1.0 + jnp.tanh(_GELU_C * (h + 0.044715 * h ** 3)))
    return (jnp.dot(g, w2, precision=hi) + b2).reshape(B, S, H)


if __name__ == "__main__":
    key = jax.random.PRNGKey(0)
    kx, kp, kx2, kp2 = jax.random.split(key, 4)

    # --- Spec shapes: config = {'hidden_size': 32, 'intermediate_size': 64} ---
    B, S, H, I = 2, 8, 32, 64
    x = jax.random.normal(kx, (B, S, H), dtype=jnp.float32)
    w1, b1, w2, b2 = init_mlp_params(kp, H, I)
    y_ref = mlp_reference(x, w1, b1, w2, b2)

    # 1) f32 MXU operand path: matches the PyTorch module closely.
    p_f32 = prepare_mlp_params(w1, b1, w2, b2, compute_dtype=jnp.float32)
    y_f32 = mlp_forward(x, p_f32)
    jax.block_until_ready(y_f32)
    assert jnp.allclose(y_f32, y_ref, atol=1e-4, rtol=1e-4), "f32 path mismatch"

    # 2) bf16 MXU operand path (perf path): f32 accumulation + f32 GELU.
    p_bf16 = prepare_mlp_params(w1, b1, w2, b2, compute_dtype=jnp.bfloat16)
    y_bf16 = mlp_forward(x, p_bf16)
    jax.block_until_ready(y_bf16)
    assert jnp.allclose(y_bf16, y_ref, atol=3e-2, rtol=3e-2), "bf16 path mismatch"

    # 3) Exercise the multi-tile machinery at still-small shapes:
    #    two M row tiles (one with padded remainder rows) x four I reduction
    #    steps (accumulator init / finalize via pl.when).
    B2, S2, H2, I2 = 2, 80, 128, 512        # M = 160
    x2 = jax.random.normal(kx2, (B2, S2, H2), dtype=jnp.float32)
    w1b, b1b, w2b, b2b = init_mlp_params(kp2, H2, I2)
    y2_ref = mlp_reference(x2, w1b, b1b, w2b, b2b)
    p2 = prepare_mlp_params(w1b, b1b, w2b, b2b, compute_dtype=jnp.float32)
    y2 = mlp_forward(x2, p2, block_m=128, block_i=128)
    jax.block_until_ready(y2)
    assert jnp.allclose(y2, y2_ref, atol=1e-3, rtol=1e-3), "multi-tile mismatch"

    print("KERNEL_OK")
</pallas_src>

<mosaic_0001>
module attributes {stable_mosaic.version = 11 : i64} {
  func.func @_mlp_kernel(%arg0: i32, %arg1: i32, %arg2: memref<16x128xf32, #tpu.memory_space<vmem>>, %arg3: memref<128x128xf32, #tpu.memory_space<vmem>>, %arg4: memref<1x128xf32, #tpu.memory_space<vmem>>, %arg5: memref<128x128xf32, #tpu.memory_space<vmem>>, %arg6: memref<1x128xf32, #tpu.memory_space<vmem>>, %arg7: memref<16x128xf32, #tpu.memory_space<vmem>>, %arg8: memref<16x128xf32, #tpu.memory_space<vmem>>) attributes {dimension_semantics = [#tpu.dimension_semantics<parallel>, #tpu.dimension_semantics<arbitrary>], iteration_bounds = array<i64: 1, 1>, scalar_prefetch = 0 : i64, scratch_operands = 1 : i64, tpu.core_type = #tpu.core_type<tc>, window_params = [{transform_indices = @transform_0, window_bounds = array<i64: 16, 128>}, {transform_indices = @transform_1, window_bounds = array<i64: 128, 128>}, {transform_indices = @transform_2, window_bounds = array<i64: 1, 128>}, {transform_indices = @transform_3, window_bounds = array<i64: 128, 128>}, {pipeline_mode = #tpu.pipeline_mode<synchronous>, transform_indices = @transform_4, window_bounds = array<i64: 1, 128>}, {transform_indices = @transform_5, window_bounds = array<i64: 16, 128>}]} {
    %c0_i32 = arith.constant 0 : i32
    %0 = arith.cmpi eq, %arg1, %c0_i32 : i32
    %1 = arith.extui %0 : i1 to i32
    %c0_i32_0 = arith.constant 0 : i32
    %2 = arith.cmpi ne, %1, %c0_i32_0 : i32
    scf.if %2 {
      %cst_19 = arith.constant 0.000000e+00 : f32
      %29 = vector.broadcast %cst_19 : f32 to vector<16x128xf32>
      %c0_20 = arith.constant 0 : index
      %c0_21 = arith.constant 0 : index
      %30 = vector.load %arg8[%c0_20, %c0_21] : memref<16x128xf32, #tpu.memory_space<vmem>>, vector<16x128xf32>
      tpu.vector_store %arg8[%c0_20, %c0_21], %29 {strides = array<i32>} : memref<16x128xf32, #tpu.memory_space<vmem>>, vector<16x128xf32>,
    } else {
    }
    %c0 = arith.constant 0 : index
    %c0_1 = arith.constant 0 : index
    %3 = vector.load %arg2[%c0, %c0_1] : memref<16x128xf32, #tpu.memory_space<vmem>>, vector<16x128xf32>
    %c0_2 = arith.constant 0 : index
    %c0_3 = arith.constant 0 : index
    %4 = vector.load %arg3[%c0_2, %c0_3] : memref<128x128xf32, #tpu.memory_space<vmem>>, vector<128x128xf32>
    %cst = arith.constant dense<0.000000e+00> : vector<16x128xf32>
    %5 = tpu.matmul %3, %4, %cst {dimension_numbers = #tpu.dot_dimension_numbers<[1], [0], [0], [1], [0, 0, 1, 1], [], []>} : vector<16x128xf32>, vector<128x128xf32>, vector<16x128xf32> -> vector<16x128xf32>
    %c0_4 = arith.constant 0 : index
    %c0_5 = arith.constant 0 : index
    %6 = vector.load %arg4[%c0_4, %c0_5] : memref<1x128xf32, #tpu.memory_space<vmem>>, vector<1x128xf32>
    %7 = vector.broadcast %6 : vector<1x128xf32> to vector<16x128xf32>
    %8 = arith.addf %5, %7 : vector<16x128xf32>
    %cst_6 = arith.constant 5.000000e-01 : f32
    %9 = vector.broadcast %cst_6 : f32 to vector<16x128xf32>
    %10 = arith.mulf %9, %8 : vector<16x128xf32>
    %11 = arith.mulf %8, %8 : vector<16x128xf32>
    %cst_7 = arith.constant 0.0356774069 : f32
    %12 = vector.broadcast %cst_7 : f32 to vector<16x128xf32>
    %13 = arith.mulf %12, %11 : vector<16x128xf32>
    %cst_8 = arith.constant 0.797884583 : f32
    %14 = vector.broadcast %cst_8 : f32 to vector<16x128xf32>
    %15 = arith.addf %14, %13 : vector<16x128xf32>
    %16 = arith.mulf %8, %15 : vector<16x128xf32>
    %17 = math.tanh %16 : vector<16x128xf32>
    %cst_9 = arith.constant 1.000000e+00 : f32
    %18 = vector.broadcast %cst_9 : f32 to vector<16x128xf32>
    %19 = arith.addf %18, %17 : vector<16x128xf32>
    %20 = arith.mulf %10, %19 : vector<16x128xf32>
    %c0_10 = arith.constant 0 : index
    %c0_11 = arith.constant 0 : index
    %21 = vector.load %arg8[%c0_10, %c0_11] : memref<16x128xf32, #tpu.memory_space<vmem>>, vector<16x128xf32>
    %c0_12 = arith.constant 0 : index
    %c0_13 = arith.constant 0 : index
    %22 = vector.load %arg5[%c0_12, %c0_13] : memref<128x128xf32, #tpu.memory_space<vmem>>, vector<128x128xf32>
    %cst_14 = arith.constant dense<0.000000e+00> : vector<16x128xf32>
    %23 = tpu.matmul %20, %22, %cst_14 {dimension_numbers = #tpu.dot_dimension_numbers<[1], [0], [0], [1], [0, 0, 1, 1], [], []>} : vector<16x128xf32>, vector<128x128xf32>, vector<16x128xf32> -> vector<16x128xf32>
    %24 = arith.addf %21, %23 : vector<16x128xf32>
    %c0_15 = arith.constant 0 : index
    %c0_16 = arith.constant 0 : index
    %25 = vector.load %arg8[%c0_15, %c0_16] : memref<16x128xf32, #tpu.memory_space<vmem>>, vector<16x128xf32>
    tpu.vector_store %arg8[%c0_15, %c0_16], %24 {strides = array<i32>} : memref<16x128xf32, #tpu.memory_space<vmem>>, vector<16x128xf32>,
    %c0_i32_17 = arith.constant 0 : i32
    %26 = arith.cmpi eq, %arg1, %c0_i32_17 : i32
    %27 = arith.extui %26 : i1 to i32
    %c0_i32_18 = arith.constant 0 : i32
    %28 = arith.cmpi ne, %27, %c0_i32_18 : i32
    scf.if %28 {
      %c0_19 = arith.constant 0 : index
      %c0_20 = arith.constant 0 : index
      %29 = vector.load %arg8[%c0_19, %c0_20] : memref<16x128xf32, #tpu.memory_space<vmem>>, vector<16x128xf32>
      %c0_21 = arith.constant 0 : index
      %c0_22 = arith.constant 0 : index
      %30 = vector.load %arg6[%c0_21, %c0_22] : memref<1x128xf32, #tpu.memory_space<vmem>>, vector<1x128xf32>
      %31 = vector.broadcast %30 : vector<1x128xf32> to vector<16x128xf32>
      %32 = arith.addf %29, %31 : vector<16x128xf32>
      %c0_23 = arith.constant 0 : index
      %c0_24 = arith.constant 0 : index
      %33 = vector.load %arg7[%c0_23, %c0_24] : memref<16x128xf32, #tpu.memory_space<vmem>>, vector<16x128xf32>
      tpu.vector_store %arg7[%c0_23, %c0_24], %32 {strides = array<i32>} : memref<16x128xf32, #tpu.memory_space<vmem>>, vector<16x128xf32>,
    } else {
    }
    return
  }
  func.func @transform_0(%arg0: i32, %arg1: i32) -> (i32, i32) {
    %c0_i32 = arith.constant 0 : i32
    %c0_i32_0 = arith.constant 0 : i32
    return %arg0, %c0_i32 : i32, i32
  }
  func.func @transform_1(%arg0: i32, %arg1: i32) -> (i32, i32) {
    %c0_i32 = arith.constant 0 : i32
    %c0_i32_0 = arith.constant 0 : i32
    return %c0_i32, %arg1 : i32, i32
  }
  func.func @transform_2(%arg0: i32, %arg1: i32) -> (i32, i32) {
    %c0_i32 = arith.constant 0 : i32
    %c0_i32_0 = arith.constant 0 : i32
    return %c0_i32, %arg1 : i32, i32
  }
  func.func @transform_3(%arg0: i32, %arg1: i32) -> (i32, i32) {
    %c0_i32 = arith.constant 0 : i32
    %c0_i32_0 = arith.constant 0 : i32
    return %arg1, %c0_i32 : i32, i32
  }
  func.func @transform_4(%arg0: i32, %arg1: i32) -> (i32, i32) {
    %c0_i32 = arith.constant 0 : i32
    %c0_i32_0 = arith.constant 0 : i32
    %c0_i32_1 = arith.constant 0 : i32
    return %c0_i32, %c0_i32_0 : i32, i32
  }
  func.func @transform_5(%arg0: i32, %arg1: i32) -> (i32, i32) {
    %c0_i32 = arith.constant 0 : i32
    %c0_i32_0 = arith.constant 0 : i32
    return %arg0, %c0_i32 : i32, i32
  }
}

</mosaic_0001>

<bundles_post_ra>
// kernel: tpu_custom_call.1
= control target key start
LH: loop header
LB: loop body
LE: loop exit
PB: predicated region body
PF: predicated region fallthrough
CT: control target
= control target key end

     0   :  { %10 = vsyncpa [#allocation4], 0  ;;  %s585_s0 = inlined_call_operand.hbm [shape: f32[16,128], index: 0, kind: input, shape index: {}]   ;;  %s586_s1 = inlined_call_operand.hbm [shape: f32[128,128], index: 1, kind: input, shape index: {}]   ;;  %s587_s2 = inlined_call_operand.vmem [shape: f32[1,128], index: 2, kind: input, shape index: {}]   ;;  %s588_s3 = inlined_call_operand.hbm [shape: f32[128,128], index: 3, kind: input, shape index: {}]   ;;  %s589_s4 = inlined_call_operand.vmem [shape: f32[1,128], index: 4, kind: input, shape index: {}]   ;;  %s590_s5 = inlined_call_operand.hbm [shape: f32[16,128], index: 5, kind: output, shape index: {}]  }
   0x1   :  { %11 = vsyncpa [#allocation7], 0 }
   0x2   :  { %12 = vsyncpa [#allocation5], 0  ;;  %s519_s18 = smov [#allocation6]   ;;  %s520_s20 = smov [#allocation3]  }
   0x3   :  { %s30_s19 = sshll.u32 %s519_s18, 4  ;;  %s18_s21 = sshll.u32 %s520_s20, 4  ;;  %s31_s19 = int_to_ptr.vmem [resolvable:$true] %s30_s19  ;;  %s19_s21 = int_to_ptr.vmem [resolvable:$true] %s18_s21 }
   0x4   :  { %s441_s22 = scalar_lea.vmem %s31_s19, 2048  ;;  %p446_p1 = scmp.lt.s32.totalorder %s31_s19, %s31_s19 }
   0x5   :  { %p442_p0 = scmp.ne.s32.totalorder %s31_s19, %s441_s22  ;;  %p447_p2 = scmp.lt.s32.totalorder %s441_s22, %s441_s22 }
   0x7   :  { %p448_p3 = por %p447_p2, %p446_p1 }
   0x9   :  { %p449_p4 = pnand %p448_p3, %p442_p0 }
   0xb   :  { %452 = shalt.err (!%p449_p4)
}
   0xc   :  { %s521_s23 = smov 128   ;;  %s522_s24 = smov 8  }
   0xd   :  { %36 = dma.hbm_to_vmem [thread:$0]  %s586_s1, 2048, %s31_s19, [#allocation7], %s521_s23, %s521_s23, %s522_s24  }
   0xe   :  { %s461_s27 = scalar_lea.vmem %s19_s21, 256  ;;  %p466_p6 = scmp.lt.s32.totalorder %s19_s21, %s19_s21 }
   0xf   :  { %p462_p5 = scmp.ne.s32.totalorder %s19_s21, %s461_s27  ;;  %p467_p7 = scmp.lt.s32.totalorder %s461_s27, %s461_s27 }
  0x11   :  { %p468_p8 = por %p467_p7, %p466_p6 }
  0x13   :  { %p469_p9 = pnand %p468_p8, %p462_p5 }
  0x15   :  { %472 = shalt.err (!%p469_p9)
}
  0x16   :  { %24 = dma.hbm_to_vmem [thread:$0]  %s585_s0, 256, %s19_s21, [#allocation4], %s521_s23, %s521_s23, %s522_s24  }
  0x17   :  { %s523_s30 = smov [#allocation8]  }
  0x18   :  { %s44_s6 = sshll.u32 %s523_s30, 4  ;;  %s45_s6 = int_to_ptr.vmem [resolvable:$true] %s44_s6 }
  0x19   :  { %s481_s7 = scalar_lea.vmem %s45_s6, 2048  ;;  %p486_p11 = scmp.lt.s32.totalorder %s45_s6, %s45_s6 }
  0x1a   :  { %p482_p10 = scmp.ne.s32.totalorder %s45_s6, %s481_s7  ;;  %p487_p12 = scmp.lt.s32.totalorder %s481_s7, %s481_s7 }
  0x1c   :  { %p488_p13 = por %p487_p12, %p486_p11 }
  0x1e   :  { %p489_p0 = pnand %p488_p13, %p482_p10 }
  0x20   :  { %492 = shalt.err (!%p489_p0)
}
  0x21   :  { %50 = dma.hbm_to_vmem [thread:$0]  %s588_s3, 2048, %s45_s6, [#allocation7], %s521_s23, %s521_s23, %s522_s24  }
  0x22   :  { %513 = dma.done.wait [#allocation4], 256  }
  0x23   :  { %514 = vsyncadd [#allocation4], 4294967040 }
  0x24   :  { %515 = dma.done.wait [#allocation7], 4096  }
  0x25   :  { %516 = vsyncadd [#allocation7], 4294963200  ;;  %v85_v0 = vld [vmem:[#allocation6 + $0x78] sm:$0xff]  ;;  %v84_v1 = vld [vmem:[#allocation6 + $0x70] sm:$0xff]  ;;  %s524_s10 = smov [#allocation9]  }
  0x26   :  { %353 = vmatprep.subr.mxu0 %v85_v0  ;;  %v83_v2 = vld [vmem:[#allocation6 + $0x68] sm:$0xff]  ;;  %v82_v3 = vld [vmem:[#allocation6 + $0x60] sm:$0xff]  ;;  %v68_v4 = vld [vmem:[#allocation3] sm:$0xff]  ;;  %s302_s11 = sshll.u32 %s524_s10, 4  ;;  %s303_s11 = int_to_ptr.vmem [resolvable:$true] %s302_s11 }
  0x27   :  { %354 = vmatpush3.msra.mxu0 %v85_v0  ;;  %v81_v5 = vld [vmem:[#allocation6 + $0x58] sm:$0xff]  ;;  %385 = vmatprep.mubr.f32.mxu0 %v68_v4  ;;  %v80_v6 = vld [vmem:[#allocation6 + $0x50] sm:$0xff]  ;;  %v79_v7 = vld [vmem:[#allocation6 + $0x48] sm:$0xff]  ;;  %s493_s12 = scalar_lea.vmem %s303_s11, 256  ;;  %p498_p2 = scmp.lt.s32.totalorder %s303_s11, %s303_s11 }
  0x28   :  { %355 = vmatprep.subr.mxu0 %v84_v1  ;;  %v78_v8 = vld [vmem:[#allocation6 + $0x40] sm:$0xff]  ;;  %v77_v9 = vld [vmem:[#allocation6 + $0x38] sm:$0xff]  ;;  %v76_v10 = vld [vmem:[#allocation6 + $0x30] sm:$0xff]  ;;  %p494_p1 = scmp.ne.s32.totalorder %s303_s11, %s493_s12  ;;  %p499_p3 = scmp.lt.s32.totalorder %s493_s12, %s493_s12 }
  0x29   :  { %356 = vmatpush3.msra.mxu0 %v84_v1  ;;  %v75_v11 = vld [vmem:[#allocation6 + $0x28] sm:$0xff]  ;;  %v74_v12 = vld [vmem:[#allocation6 + $0x20] sm:$0xff]  ;;  %v73_v13 = vld [vmem:[#allocation6 + $0x18] sm:$0xff] }
  0x2a   :  { %357 = vmatprep.subr.mxu0 %v83_v2  ;;  %v72_v14 = vld [vmem:[#allocation6 + $0x10] sm:$0xff]  ;;  %v71_v15 = vld [vmem:[#allocation6 + $0x8] sm:$0xff]  ;;  %v70_v16 = vld [vmem:[#allocation6] sm:$0xff]  ;;  %p500_p4 = por %p499_p3, %p498_p2 }
  0x2b   :  { %358 = vmatpush3.msra.mxu0 %v83_v2  ;;  %v69_v17 = vld [vmem:[#allocation3 + $0x8] sm:$0xff]  ;;  %v200_v19 = vld [vmem:[#allocation8 + $0x70] sm:$0xff]  ;;  %v199_v20 = vld [vmem:[#allocation8 + $0x68] sm:$0xff] }
  0x2c   :  { %359 = vmatprep.subr.mxu0 %v82_v3  ;;  %v201_v18 = vld [vmem:[#allocation8 + $0x78] sm:$0xff]  ;;  %v198_v21 = vld [vmem:[#allocation8 + $0x60] sm:$0xff]  ;;  %v196_v23 = vld [vmem:[#allocation8 + $0x50] sm:$0xff]  ;;  %p501_p5 = pnand %p500_p4, %p494_p1 }
  0x2d   :  { %360 = vmatpush3.msra.mxu0 %v82_v3  ;;  %388 = vmatprep.subr.mxu1 %v201_v18  ;;  %v197_v22 = vld [vmem:[#allocation8 + $0x58] sm:$0xff]  ;;  %v195_v24 = vld [vmem:[#allocation8 + $0x48] sm:$0xff]  ;;  %v194_v25 = vld [vmem:[#allocation8 + $0x40] sm:$0xff] }
  0x2e   :  { %361 = vmatprep.subr.mxu0 %v81_v5  ;;  %389 = vmatpush3.msra.mxu1 %v201_v18  ;;  %v193_v26 = vld [vmem:[#allocation8 + $0x38] sm:$0xff]  ;;  %v192_v27 = vld [vmem:[#allocation8 + $0x30] sm:$0xff]  ;;  %v191_v28 = vld [vmem:[#allocation8 + $0x28] sm:$0xff] }
  0x2f   :  { %362 = vmatpush3.msra.mxu0 %v81_v5  ;;  %390 = vmatprep.subr.mxu1 %v200_v19  ;;  %v190_v29 = vld [vmem:[#allocation8 + $0x20] sm:$0xff]  ;;  %v189_v30 = vld [vmem:[#allocation8 + $0x18] sm:$0xff]  ;;  %v188_v31 = vld [vmem:[#allocation8 + $0x10] sm:$0xff] }
  0x30   :  { %363 = vmatprep.subr.mxu0 %v80_v6  ;;  %391 = vmatpush3.msra.mxu1 %v200_v19  ;;  %v187_v32 = vld [vmem:[#allocation8 + $0x8] sm:$0xff]  ;;  %v186_v33 = vld [vmem:[#allocation8] sm:$0xff]  ;;  %v315_v34 = vld [vmem:[%s587_s2] ss:$0 sm:$0xff] }
  0x31   :  { %364 = vmatpush3.msra.mxu0 %v80_v6  ;;  %392 = vmatprep.subr.mxu1 %v199_v20  ;;  %v316_v55 = vld [vmem:[%s589_s4] ss:$0 sm:$0xff] }
  0x32   :  { %365 = vmatprep.subr.mxu0 %v79_v7  ;;  %393 = vmatpush3.msra.mxu1 %v199_v20 }
  0x33   :  { %366 = vmatpush3.msra.mxu0 %v79_v7  ;;  %394 = vmatprep.subr.mxu1 %v198_v21 }
  0x34   :  { %367 = vmatprep.subr.mxu0 %v78_v8  ;;  %395 = vmatpush3.msra.mxu1 %v198_v21 }
  0x35   :  { %368 = vmatpush3.msra.mxu0 %v78_v8  ;;  %396 = vmatprep.subr.mxu1 %v197_v22 }
  0x36   :  { %369 = vmatprep.subr.mxu0 %v77_v9  ;;  %397 = vmatpush3.msra.mxu1 %v197_v22 }
  0x37   :  { %370 = vmatpush3.msra.mxu0 %v77_v9  ;;  %398 = vmatprep.subr.mxu1 %v196_v23 }
  0x38   :  { %371 = vmatprep.subr.mxu0 %v76_v10  ;;  %399 = vmatpush3.msra.mxu1 %v196_v23 }
  0x39   :  { %372 = vmatpush3.msra.mxu0 %v76_v10  ;;  %400 = vmatprep.subr.mxu1 %v195_v24 }
  0x3a   :  { %373 = vmatprep.subr.mxu0 %v75_v11  ;;  %401 = vmatpush3.msra.mxu1 %v195_v24 }
  0x3b   :  { %374 = vmatpush3.msra.mxu0 %v75_v11  ;;  %402 = vmatprep.subr.mxu1 %v194_v25 }
  0x3c   :  { %375 = vmatprep.subr.mxu0 %v74_v12  ;;  %403 = vmatpush3.msra.mxu1 %v194_v25 }
  0x3d   :  { %376 = vmatpush3.msra.mxu0 %v74_v12  ;;  %404 = vmatprep.subr.mxu1 %v193_v26 }
  0x3e   :  { %377 = vmatprep.subr.mxu0 %v73_v13  ;;  %405 = vmatpush3.msra.mxu1 %v193_v26 }
  0x3f   :  { %378 = vmatpush3.msra.mxu0 %v73_v13  ;;  %406 = vmatprep.subr.mxu1 %v192_v27 }
  0x40   :  { %379 = vmatprep.subr.mxu0 %v72_v14  ;;  %407 = vmatpush3.msra.mxu1 %v192_v27 }
  0x41   :  { %380 = vmatpush3.msra.mxu0 %v72_v14  ;;  %408 = vmatprep.subr.mxu1 %v191_v28 }
  0x42   :  { %381 = vmatprep.subr.mxu0 %v71_v15  ;;  %409 = vmatpush3.msra.mxu1 %v191_v28 }
  0x43   :  { %382 = vmatpush3.msra.mxu0 %v71_v15  ;;  %410 = vmatprep.subr.mxu1 %v190_v29 }
  0x44   :  { %383 = vmatprep.subr.mxu0 %v70_v16  ;;  %411 = vmatpush3.msra.mxu1 %v190_v29 }
  0x45   :  { %384 = vmatpush3.msra.mxu0 %v70_v16  ;;  %412 = vmatprep.subr.mxu1 %v189_v30 }
  0x46   :  { %386 = vmatmul.mubr.f32.vlgmr.msra.gmra.mxu0 %v69_v17  ;;  %413 = vmatpush3.msra.mxu1 %v189_v30 }
  0x47   :  { %414 = vmatprep.subr.mxu1 %v188_v31 }
  0x48   :  { %415 = vmatpush3.msra.mxu1 %v188_v31 }
  0x49   :  { %416 = vmatprep.subr.mxu1 %v187_v32 }
  0x4a   :  { %417 = vmatpush3.msra.mxu1 %v187_v32 }
  0x4b   :  { %418 = vmatprep.subr.mxu1 %v186_v33 }
  0x4c   :  { %419 = vmatpush3.msra.mxu1 %v186_v33 }
 0x106   :  { %v387_v35 = vpop.f32.mrf.mxu0 }
 0x107   :  { %v165_v36 = vadd.f32 %v387_v35, %v315_v34 }
 0x108   :  { %v159_v37 = vpop.f32.mrf.mxu0 }
 0x109   :  { %v171_v38 = vmul.f32 %v165_v36, %v165_v36  ;;  %v160_v39 = vadd.f32 %v315_v34, %v159_v37  ;;  %v169_v52 = vmul.f32 0.5, %v165_v36 }
 0x10b   :  { %v173_v40 = vmul.f32 0.035677407, %v171_v38  ;;  %v170_v41 = vmul.f32 %v160_v39, %v160_v39  ;;  %v168_v50 = vmul.f32 0.5, %v160_v39 }
 0x10d   :  { %v175_v42 = vadd.f32 0.7978846, %v173_v40  ;;  %v172_v43 = vmul.f32 0.035677407, %v170_v41 }
 0x10f   :  { %v177_v44 = vmul.f32 %v175_v42, %v165_v36  ;;  %v174_v45 = vadd.f32 0.7978846, %v172_v43 }
 0x111   :  { %429 = vtanh.f32 %v177_v44  ;;  %v176_v46 = vmul.f32 %v174_v45, %v160_v39 }
 0x113   :  { %431 = vtanh.f32 %v176_v46 }
 0x11e   :  { %v430_v47 = vpop.eup %429 }
 0x11f   :  { %v181_v49 = vadd.f32 1.0, %v430_v47 }
 0x120   :  { %v432_v48 = vpop.eup %431 }
 0x121   :  { %v180_v51 = vadd.f32 1.0, %v432_v48  ;;  %v183_v54 = vmul.f32 %v181_v49, %v169_v52 }
 0x123   :  { %v182_v53 = vmul.f32 %v180_v51, %v168_v50 }
 0x125   :  { %420 = vmatprep.mubr.f32.mxu1 %v182_v53 }
 0x126   :  { %421 = vmatmul.mubr.f32.vlgmr.msra.gmra.mxu1 %v183_v54 }
 0x1e6   :  { %v422_v56 = vpop.f32.mrf.mxu1 }
 0x1e7   :  { %v294_v57 = vadd.f32 %v422_v56, %v316_v55 }
 0x1e8   :  { %v268_v58 = vpop.f32.mrf.mxu1 }
 0x1e9   :  { %296 = vst [vmem:[#allocation9 + $0x8] sm:$0xff] %v294_v57  ;;  %v293_v59 = vadd.f32 %v316_v55, %v268_v58 }
 0x1eb   :  { %295 = vst [vmem:[#allocation9] sm:$0xff] %v293_v59 }
 0x1ec   :  { %504 = shalt.err (!%p501_p5)
}
 0x1ed   :  { %308 = dma.vmem_to_hbm [thread:$0]  %s303_s11, 256, %s590_s5, [#allocation5], %s521_s23, %s521_s23, %s522_s24  }
 0x1ee   :  { %517 = dma.done.wait [#allocation5], 256  }
 0x1ef   :  { %518 = vsyncadd [#allocation5], 4294967040 }
 0x1f0   :  { %312 = vsyncpa [#allocation4], 1 }
 0x1f1   :  { %313 = vsyncpa [#allocation7], 1 }
 0x1f2   :  { %314 = vsyncpa [#allocation5], 1 }

</bundles_post_ra>
